<compile_context>
chip_gen: v6e
topology: v6e:2x2x1
jax: 0.10.0
libtpu: 0.0.40
codegen_flags: <defaults>
</compile_context>

<pallas_src>
import functools
import math

import jax
import jax.numpy as jnp
from jax.experimental import pallas as pl
from jax.experimental.pallas import tpu as pltpu


def _round_up(v, m):
    return ((v + m - 1) // m) * m


def _equal_linear_kernel(x_ref, w_ref, b_ref, o_ref, *, scale, lr_mul):
    # x_ref: (tm, in_p), w_ref: (tn, in_p), b_ref: (1, tn), o_ref: (tm, tn)
    # MXU matmul: contract over in_dim, accumulate in f32.
    acc = jax.lax.dot_general(
        x_ref[...], w_ref[...],
        dimension_numbers=(((1,), (1,)), ((), ())),
        preferred_element_type=jnp.float32,
    )
    # Equalized-LR scale + bias fused into a single f32 VPU pass over the acc.
    o_ref[...] = (acc * scale + b_ref[...] * lr_mul).astype(o_ref.dtype)


def equal_linear(x, weight, bias, *, lr_mul=1.0, tm=None, tn=None, use_bf16=True):
    """EqualLinear forward.  x: (B, in_dim); weight: (out_dim, in_dim); bias: (out_dim,)."""
    B, in_dim = x.shape
    out_dim, in_dim_w = weight.shape
    assert in_dim == in_dim_w, "weight / input dim mismatch"
    scale = 1.0 / math.sqrt(in_dim) * lr_mul

    # ---- lane-dense padding: feature dims up to multiples of 128 -------------
    in_p = _round_up(in_dim, 128)
    out_p = _round_up(out_dim, 128)

    # ---- tile sizes -----------------------------------------------------------
    if tm is None:
        tm = min(_round_up(B, 128), 512)     # fill MXU rows, stay inside VMEM budget
    if tn is None:
        tn = out_p if out_p <= 512 else (256 if out_p % 256 == 0 else 128)
    b_p = _round_up(B, tm)                   # pad batch so every tile is full

    mxu_dtype = jnp.bfloat16 if use_bf16 else x.dtype

    x_p = jnp.pad(x, ((0, b_p - B), (0, in_p - in_dim))).astype(mxu_dtype)
    w_p = jnp.pad(weight, ((0, out_p - out_dim), (0, in_p - in_dim))).astype(mxu_dtype)
    bias2d = jnp.pad(bias, (0, out_p - out_dim)).astype(jnp.float32).reshape(1, out_p)

    grid_m = b_p // tm
    grid_n = out_p // tn
    # Weight/bias blocks move only along the N axis; with a single N block they
    # are fully grid-invariant and a single VMEM buffer suffices.
    single_buffer_resident = (grid_n == 1)

    kernel = functools.partial(_equal_linear_kernel, scale=scale, lr_mul=lr_mul)

    # VMEM budget: double-buffered x/out tiles + resident weight/bias tiles.
    def _nbytes(shape, dtype):
        return math.prod(shape) * jnp.dtype(dtype).itemsize

    est = (2 * _nbytes((tm, in_p), mxu_dtype)
           + 2 * _nbytes((tn, in_p), mxu_dtype)
           + 2 * _nbytes((8, tn), jnp.float32)
           + 2 * _nbytes((tm, tn), x.dtype))
    vmem_limit = int(min(max(2 * est, 32 * 1024 * 1024), 64 * 1024 * 1024))

    def _build(resident_single_buffer):
        w_kwargs = {}
        if resident_single_buffer:
            w_kwargs = dict(pipeline_mode=pl.Buffered(1))
        in_specs = [
            pl.BlockSpec((tm, in_p), lambda i, j: (i, 0)),
            pl.BlockSpec((tn, in_p), lambda i, j: (j, 0), **w_kwargs),
            pl.BlockSpec((1, tn), lambda i, j: (0, j), **w_kwargs),
        ]
        return pl.pallas_call(
            kernel,
            out_shape=jax.ShapeDtypeStruct((b_p, out_p), x.dtype),
            grid_spec=pltpu.PrefetchScalarGridSpec(
                num_scalar_prefetch=0,
                grid=(grid_m, grid_n),
                in_specs=in_specs,
                out_specs=pl.BlockSpec((tm, tn), lambda i, j: (i, j)),
            ),
            compiler_params=pltpu.CompilerParams(
                dimension_semantics=("parallel", "parallel"),
                vmem_limit_bytes=vmem_limit,
            ),
        )

    if single_buffer_resident:
        try:
            out_padded = _build(True)(x_p, w_p, bias2d)
        except Exception:
            # Fallback if the installed JAX does not accept Buffered(1).
            out_padded = _build(False)(x_p, w_p, bias2d)
    else:
        out_padded = _build(False)(x_p, w_p, bias2d)

    return out_padded[:B, :out_dim]


def equal_linear_ref(x, weight, bias, *, lr_mul=1.0):
    scale = 1.0 / math.sqrt(x.shape[-1]) * lr_mul
    return x @ (weight * scale).T + bias * lr_mul


if __name__ == "__main__":
    key = jax.random.PRNGKey(0)
    k_x, k_w = jax.random.split(key)

    B, in_dim, out_dim = 8, 32, 64
    lr_mul = 0.5
    bias_init = 0.1

    x = jax.random.normal(k_x, (B, in_dim), dtype=jnp.float32)
    # Parameter init mirrors the PyTorch __init__: randn(out,in)/lr_mul, bias=bias_init.
    weight = jax.random.normal(k_w, (out_dim, in_dim), dtype=jnp.float32) / lr_mul
    bias = jnp.full((out_dim,), bias_init, dtype=jnp.float32)

    ref = equal_linear_ref(x, weight, bias, lr_mul=lr_mul)

    # f32-operand path: exact-semantics check.
    out_f32 = jax.block_until_ready(
        equal_linear(x, weight, bias, lr_mul=lr_mul, use_bf16=False))
    assert out_f32.shape == (B, out_dim)
    assert jnp.allclose(out_f32, ref, atol=1e-4, rtol=1e-4), "f32 path mismatch vs reference"

    # Default bf16-MXU fast path: tolerance accounts for bf16 operand rounding.
    out_bf16 = jax.block_until_ready(equal_linear(x, weight, bias, lr_mul=lr_mul))
    assert out_bf16.shape == (B, out_dim)
    assert jnp.allclose(out_bf16, ref, atol=3e-2, rtol=3e-2), "bf16 path mismatch vs reference"

    print("KERNEL_OK")
</pallas_src>

<mosaic_0001>
module attributes {stable_mosaic.version = 11 : i64} {
  func.func @_equal_linear_kernel(%arg0: i32, %arg1: i32, %arg2: memref<128x128xf32, #tpu.memory_space<vmem>>, %arg3: memref<128x128xf32, #tpu.memory_space<vmem>>, %arg4: memref<1x128xf32, #tpu.memory_space<vmem>>, %arg5: memref<128x128xf32, #tpu.memory_space<vmem>>) attributes {dimension_semantics = [#tpu.dimension_semantics<parallel>, #tpu.dimension_semantics<parallel>], iteration_bounds = array<i64: 1, 1>, scalar_prefetch = 0 : i64, scratch_operands = 0 : i64, tpu.core_type = #tpu.core_type<tc>, window_params = [{transform_indices = @transform_0, window_bounds = array<i64: 128, 128>}, {pipeline_mode = #tpu.pipeline_mode<synchronous>, transform_indices = @transform_1, window_bounds = array<i64: 128, 128>}, {pipeline_mode = #tpu.pipeline_mode<synchronous>, transform_indices = @transform_2, window_bounds = array<i64: 1, 128>}, {transform_indices = @transform_3, window_bounds = array<i64: 128, 128>}]} {
    %c0 = arith.constant 0 : index
    %c0_0 = arith.constant 0 : index
    %0 = vector.load %arg2[%c0, %c0_0] : memref<128x128xf32, #tpu.memory_space<vmem>>, vector<128x128xf32>
    %c0_1 = arith.constant 0 : index
    %c0_2 = arith.constant 0 : index
    %1 = vector.load %arg3[%c0_1, %c0_2] : memref<128x128xf32, #tpu.memory_space<vmem>>, vector<128x128xf32>
    %cst = arith.constant dense<0.000000e+00> : vector<128x128xf32>
    %2 = tpu.matmul %0, %1, %cst {dimension_numbers = #tpu.dot_dimension_numbers<[1], [1], [0], [0], [0, 0, 1, 0], [], []>} : vector<128x128xf32>, vector<128x128xf32>, vector<128x128xf32> -> vector<128x128xf32>
    %cst_3 = arith.constant 0.0883883461 : f32
    %3 = vector.broadcast %cst_3 : f32 to vector<128x128xf32>
    %4 = arith.mulf %2, %3 : vector<128x128xf32>
    %c0_4 = arith.constant 0 : index
    %c0_5 = arith.constant 0 : index
    %5 = vector.load %arg4[%c0_4, %c0_5] : memref<1x128xf32, #tpu.memory_space<vmem>>, vector<1x128xf32>
    %cst_6 = arith.constant 5.000000e-01 : f32
    %6 = vector.broadcast %cst_6 : f32 to vector<1x128xf32>
    %7 = arith.mulf %5, %6 : vector<1x128xf32>
    %8 = vector.broadcast %7 : vector<1x128xf32> to vector<128x128xf32>
    %9 = arith.addf %4, %8 : vector<128x128xf32>
    %c0_7 = arith.constant 0 : index
    %c0_8 = arith.constant 0 : index
    %10 = vector.load %arg5[%c0_7, %c0_8] : memref<128x128xf32, #tpu.memory_space<vmem>>, vector<128x128xf32>
    tpu.vector_store %arg5[%c0_7, %c0_8], %9 {strides = array<i32>} : memref<128x128xf32, #tpu.memory_space<vmem>>, vector<128x128xf32>,
    return
  }
  func.func @transform_0(%arg0: i32, %arg1: i32) -> (i32, i32) {
    %c0_i32 = arith.constant 0 : i32
    %c0_i32_0 = arith.constant 0 : i32
    return %arg0, %c0_i32 : i32, i32
  }
  func.func @transform_1(%arg0: i32, %arg1: i32) -> (i32, i32) {
    %c0_i32 = arith.constant 0 : i32
    %c0_i32_0 = arith.constant 0 : i32
    return %arg1, %c0_i32 : i32, i32
  }
  func.func @transform_2(%arg0: i32, %arg1: i32) -> (i32, i32) {
    %c0_i32 = arith.constant 0 : i32
    %c0_i32_0 = arith.constant 0 : i32
    return %c0_i32, %arg1 : i32, i32
  }
  func.func @transform_3(%arg0: i32, %arg1: i32) -> (i32, i32) {
    %c0_i32 = arith.constant 0 : i32
    return %arg0, %arg1 : i32, i32
  }
}

module attributes {stable_mosaic.version = 11 : i64} {
  func.func @_equal_linear_kernel(%arg0: i32, %arg1: i32, %arg2: memref<128x128xf32, #tpu.memory_space<vmem>>, %arg3: memref<128x128xf32, #tpu.memory_space<vmem>>, %arg4: memref<1x128xf32, #tpu.memory_space<vmem>>, %arg5: memref<128x128xf32, #tpu.memory_space<vmem>>) attributes {dimension_semantics = [#tpu.dimension_semantics<parallel>, #tpu.dimension_semantics<parallel>], iteration_bounds = array<i64: 1, 1>, scalar_prefetch = 0 : i64, scratch_operands = 0 : i64, tpu.core_type = #tpu.core_type<tc>, window_params = [{transform_indices = @transform_0, window_bounds = array<i64: 128, 128>}, {transform_indices = @transform_1, window_bounds = array<i64: 128, 128>}, {transform_indices = @transform_2, window_bounds = array<i64: 1, 128>}, {transform_indices = @transform_3, window_bounds = array<i64: 128, 128>}]} {
    %c0 = arith.constant 0 : index
    %c0_0 = arith.constant 0 : index
    %0 = vector.load %arg2[%c0, %c0_0] : memref<128x128xf32, #tpu.memory_space<vmem>>, vector<128x128xf32>
    %c0_1 = arith.constant 0 : index
    %c0_2 = arith.constant 0 : index
    %1 = vector.load %arg3[%c0_1, %c0_2] : memref<128x128xf32, #tpu.memory_space<vmem>>, vector<128x128xf32>
    %cst = arith.constant dense<0.000000e+00> : vector<128x128xf32>
    %2 = tpu.matmul %0, %1, %cst {dimension_numbers = #tpu.dot_dimension_numbers<[1], [1], [0], [0], [0, 0, 1, 0], [], []>} : vector<128x128xf32>, vector<128x128xf32>, vector<128x128xf32> -> vector<128x128xf32>
    %cst_3 = arith.constant 0.0883883461 : f32
    %3 = vector.broadcast %cst_3 : f32 to vector<128x128xf32>
    %4 = arith.mulf %2, %3 : vector<128x128xf32>
    %c0_4 = arith.constant 0 : index
    %c0_5 = arith.constant 0 : index
    %5 = vector.load %arg4[%c0_4, %c0_5] : memref<1x128xf32, #tpu.memory_space<vmem>>, vector<1x128xf32>
    %cst_6 = arith.constant 5.000000e-01 : f32
    %6 = vector.broadcast %cst_6 : f32 to vector<1x128xf32>
    %7 = arith.mulf %5, %6 : vector<1x128xf32>
    %8 = vector.broadcast %7 : vector<1x128xf32> to vector<128x128xf32>
    %9 = arith.addf %4, %8 : vector<128x128xf32>
    %c0_7 = arith.constant 0 : index
    %c0_8 = arith.constant 0 : index
    %10 = vector.load %arg5[%c0_7, %c0_8] : memref<128x128xf32, #tpu.memory_space<vmem>>, vector<128x128xf32>
    tpu.vector_store %arg5[%c0_7, %c0_8], %9 {strides = array<i32>} : memref<128x128xf32, #tpu.memory_space<vmem>>, vector<128x128xf32>,
    return
  }
  func.func @transform_0(%arg0: i32, %arg1: i32) -> (i32, i32) {
    %c0_i32 = arith.constant 0 : i32
    %c0_i32_0 = arith.constant 0 : i32
    return %arg0, %c0_i32 : i32, i32
  }
  func.func @transform_1(%arg0: i32, %arg1: i32) -> (i32, i32) {
    %c0_i32 = arith.constant 0 : i32
    %c0_i32_0 = arith.constant 0 : i32
    return %arg1, %c0_i32 : i32, i32
  }
  func.func @transform_2(%arg0: i32, %arg1: i32) -> (i32, i32) {
    %c0_i32 = arith.constant 0 : i32
    %c0_i32_0 = arith.constant 0 : i32
    return %c0_i32, %arg1 : i32, i32
  }
  func.func @transform_3(%arg0: i32, %arg1: i32) -> (i32, i32) {
    %c0_i32 = arith.constant 0 : i32
    return %arg0, %arg1 : i32, i32
  }
}

</mosaic_0001>

<bundles_post_ra>
// kernel: tpu_custom_call.1
= control target key start
LH: loop header
LB: loop body
LE: loop exit
PB: predicated region body
PF: predicated region fallthrough
CT: control target
= control target key end

     0   :  { %8 = vsyncpa [#allocation3], 0  ;;  %s549_s0 = inlined_call_operand.hbm [shape: f32[128,128], index: 0, kind: input, shape index: {}]   ;;  %s550_s1 = inlined_call_operand.hbm [shape: f32[128,128], index: 1, kind: input, shape index: {}]   ;;  %s551_s2 = inlined_call_operand.vmem [shape: f32[1,128], index: 2, kind: input, shape index: {}]   ;;  %s552_s3 = inlined_call_operand.hbm [shape: f32[128,128], index: 3, kind: output, shape index: {}]  }
   0x1   :  { %9 = vsyncpa [#allocation6], 0 }
   0x2   :  { %10 = vsyncpa [#allocation4], 0  ;;  %s485_s12 = smov [#allocation2]  }
   0x3   :  { %s16_s13 = sshll.u32 %s485_s12, 4  ;;  %s17_s13 = int_to_ptr.vmem [resolvable:$true] %s16_s13 }
   0x4   :  { %s427_s14 = scalar_lea.vmem %s17_s13, 2048  ;;  %p432_p1 = scmp.lt.s32.totalorder %s17_s13, %s17_s13 }
   0x5   :  { %p428_p0 = scmp.ne.s32.totalorder %s17_s13, %s427_s14  ;;  %p433_p2 = scmp.lt.s32.totalorder %s427_s14, %s427_s14 }
   0x7   :  { %p434_p3 = por %p433_p2, %p432_p1 }
   0x9   :  { %p435_p4 = pnand %p434_p3, %p428_p0 }
   0xb   :  { %438 = shalt.err (!%p435_p4)
}
   0xc   :  { %s486_s15 = smov 128   ;;  %s487_s16 = smov 8  }
   0xd   :  { %22 = dma.hbm_to_vmem [thread:$0]  %s549_s0, 2048, %s17_s13, [#allocation3], %s486_s15, %s486_s15, %s487_s16  }
   0xe   :  { %s488_s19 = smov [#allocation5]  }
   0xf   :  { %s28_s20 = sshll.u32 %s488_s19, 4  ;;  %s29_s20 = int_to_ptr.vmem [resolvable:$true] %s28_s20 }
  0x10   :  { %s447_s21 = scalar_lea.vmem %s29_s20, 2048  ;;  %p452_p6 = scmp.lt.s32.totalorder %s29_s20, %s29_s20 }
  0x11   :  { %p448_p5 = scmp.ne.s32.totalorder %s29_s20, %s447_s21  ;;  %p453_p7 = scmp.lt.s32.totalorder %s447_s21, %s447_s21 }
  0x13   :  { %p454_p8 = por %p453_p7, %p452_p6 }
  0x15   :  { %p455_p9 = pnand %p454_p8, %p448_p5 }
  0x17   :  { %458 = shalt.err (!%p455_p9)
}
  0x18   :  { %34 = dma.hbm_to_vmem [thread:$0]  %s550_s1, 2048, %s29_s20, [#allocation6], %s486_s15, %s486_s15, %s487_s16  }
  0x19   :  { %479 = dma.done.wait [#allocation3], 2048  }
  0x1a   :  { %480 = vsyncadd [#allocation3], 4294965248 }
  0x1b   :  { %481 = dma.done.wait [#allocation6], 2048  }
  0x1c   :  { %482 = vsyncadd [#allocation6], 4294965248  ;;  %v74_v0 = vld [vmem:[#allocation5 + $0x78] sm:$0xff]  ;;  %v73_v1 = vld [vmem:[#allocation5 + $0x70] sm:$0xff]  ;;  %v239_v32 = vlaneseq }
  0x1d   :  { %326 = vmatprep.subr.mxu0 %v74_v0  ;;  %382 = vmatprep.subr.mxu1 %v74_v0  ;;  %v72_v2 = vld [vmem:[#allocation5 + $0x68] sm:$0xff]  ;;  %v43_v3 = vld [vmem:[#allocation2] sm:$0xff]  ;;  %v70_v6 = vld [vmem:[#allocation5 + $0x58] sm:$0xff] }
  0x1e   :  { %327 = vmatpush3.xpose.msra.mxu0 %v74_v0  ;;  %398 = vmatpush3.xpose.msra.mxu1 %v74_v0  ;;  %v51_v4 = vld [vmem:[#allocation2 + $0x40] sm:$0xff]  ;;  %v69_v7 = vld [vmem:[#allocation5 + $0x50] sm:$0xff]  ;;  %v68_v8 = vld [vmem:[#allocation5 + $0x48] sm:$0xff]  ;;  %v240_v33 = vshrl.u32 %v239_v32, 7 }
  0x1f   :  { %328 = vmatprep.subr.mxu0 %v73_v1  ;;  %383 = vmatprep.subr.mxu1 %v73_v1  ;;  %v71_v5 = vld [vmem:[#allocation5 + $0x60] sm:$0xff]  ;;  %v66_v10 = vld [vmem:[#allocation5 + $0x38] sm:$0xff]  ;;  %v65_v11 = vld [vmem:[#allocation5 + $0x30] sm:$0xff] }
  0x20   :  { %358 = vmatprep.mubr.f32.mxu0 %v43_v3  ;;  %370 = vmatprep.mubr.f32.mxu1 %v51_v4  ;;  %v67_v9 = vld [vmem:[#allocation5 + $0x40] sm:$0xff]  ;;  %v64_v12 = vld [vmem:[#allocation5 + $0x28] sm:$0xff]  ;;  %v62_v14 = vld [vmem:[#allocation5 + $0x18] sm:$0xff]  ;;  %v241_v36 = vsub.s32 0, %v240_v33 }
  0x21   :  { %v63_v13 = vld [vmem:[#allocation5 + $0x20] sm:$0xff]  ;;  %v61_v15 = vld [vmem:[#allocation5 + $0x10] sm:$0xff]  ;;  %v60_v16 = vld [vmem:[#allocation5 + $0x8] sm:$0xff] }
  0x22   :  { %329 = vmatpush3.xpose.msra.mxu0 %v73_v1  ;;  %399 = vmatpush3.xpose.msra.mxu1 %v73_v1  ;;  %v59_v17 = vld [vmem:[#allocation5] sm:$0xff]  ;;  %v44_v18 = vld [vmem:[#allocation2 + $0x8] sm:$0xff]  ;;  %v45_v20 = vld [vmem:[#allocation2 + $0x10] sm:$0xff] }
  0x23   :  { %330 = vmatprep.subr.mxu0 %v72_v2  ;;  %384 = vmatprep.subr.mxu1 %v72_v2  ;;  %v52_v19 = vld [vmem:[#allocation2 + $0x48] sm:$0xff]  ;;  %v53_v21 = vld [vmem:[#allocation2 + $0x50] sm:$0xff]  ;;  %v46_v22 = vld [vmem:[#allocation2 + $0x18] sm:$0xff] }
  0x24   :  { %v54_v23 = vld [vmem:[#allocation2 + $0x58] sm:$0xff]  ;;  %v47_v24 = vld [vmem:[#allocation2 + $0x20] sm:$0xff]  ;;  %v48_v26 = vld [vmem:[#allocation2 + $0x28] sm:$0xff] }
  0x25   :  { %v55_v25 = vld [vmem:[#allocation2 + $0x60] sm:$0xff]  ;;  %v56_v27 = vld [vmem:[#allocation2 + $0x68] sm:$0xff]  ;;  %v49_v28 = vld [vmem:[#allocation2 + $0x30] sm:$0xff] }
  0x26   :  { %331 = vmatpush3.xpose.msra.mxu0 %v72_v2  ;;  %400 = vmatpush3.xpose.msra.mxu1 %v72_v2  ;;  %v57_v29 = vld [vmem:[#allocation2 + $0x70] sm:$0xff]  ;;  %v50_v30 = vld [vmem:[#allocation2 + $0x38] sm:$0xff]  ;;  %v236_v34 = vld [vmem:[%s551_s2] sm:$0x1]  ;;  %s489_s2 = smov [#allocation7]  }
  0x27   :  { %332 = vmatprep.subr.mxu0 %v71_v5  ;;  %385 = vmatprep.subr.mxu1 %v71_v5  ;;  %v58_v31 = vld [vmem:[#allocation2 + $0x78] sm:$0xff]  ;;  %v237_v35 = vmul.f32 0.5, %v236_v34  ;;  %s281_s24 = sshll.u32 %s489_s2, 4  ;;  %s282_s24 = int_to_ptr.vmem [resolvable:$true] %s281_s24 }
  0x28   :  { %s459_s25 = scalar_lea.vmem %s282_s24, 2048  ;;  %p464_p11 = scmp.lt.s32.totalorder %s282_s24, %s282_s24 }
  0x29   :  { %v525_v37 = vrot.slane %v237_v35, %v241_v36  ;;  %p460_p10 = scmp.ne.s32.totalorder %s282_s24, %s459_s25  ;;  %p465_p12 = scmp.lt.s32.totalorder %s459_s25, %s459_s25 }
  0x2a   :  { %333 = vmatpush3.xpose.msra.mxu0 %v71_v5  ;;  %401 = vmatpush3.xpose.msra.mxu1 %v71_v5 }
  0x2b   :  { %334 = vmatprep.subr.mxu0 %v70_v6  ;;  %386 = vmatprep.subr.mxu1 %v70_v6  ;;  %p466_p13 = por %p465_p12, %p464_p11 }
  0x2d   :  { %p467_p0 = pnand %p466_p13, %p460_p10 }
  0x2e   :  { %335 = vmatpush3.xpose.msra.mxu0 %v70_v6  ;;  %402 = vmatpush3.xpose.msra.mxu1 %v70_v6 }
  0x2f   :  { %336 = vmatprep.subr.mxu0 %v69_v7  ;;  %387 = vmatprep.subr.mxu1 %v69_v7 }
  0x32   :  { %337 = vmatpush3.xpose.msra.mxu0 %v69_v7  ;;  %403 = vmatpush3.xpose.msra.mxu1 %v69_v7 }
  0x33   :  { %338 = vmatprep.subr.mxu0 %v68_v8  ;;  %388 = vmatprep.subr.mxu1 %v68_v8 }
  0x36   :  { %339 = vmatpush3.xpose.msra.mxu0 %v68_v8  ;;  %404 = vmatpush3.xpose.msra.mxu1 %v68_v8 }
  0x37   :  { %340 = vmatprep.subr.mxu0 %v67_v9  ;;  %389 = vmatprep.subr.mxu1 %v67_v9 }
  0x3a   :  { %341 = vmatpush3.xpose.msra.mxu0 %v67_v9  ;;  %405 = vmatpush3.xpose.msra.mxu1 %v67_v9 }
  0x3b   :  { %342 = vmatprep.subr.mxu0 %v66_v10  ;;  %390 = vmatprep.subr.mxu1 %v66_v10 }
  0x3e   :  { %343 = vmatpush3.xpose.msra.mxu0 %v66_v10  ;;  %406 = vmatpush3.xpose.msra.mxu1 %v66_v10 }
  0x3f   :  { %344 = vmatprep.subr.mxu0 %v65_v11  ;;  %391 = vmatprep.subr.mxu1 %v65_v11 }
  0x42   :  { %345 = vmatpush3.xpose.msra.mxu0 %v65_v11  ;;  %407 = vmatpush3.xpose.msra.mxu1 %v65_v11 }
  0x43   :  { %346 = vmatprep.subr.mxu0 %v64_v12  ;;  %392 = vmatprep.subr.mxu1 %v64_v12 }
  0x46   :  { %347 = vmatpush3.xpose.msra.mxu0 %v64_v12  ;;  %408 = vmatpush3.xpose.msra.mxu1 %v64_v12 }
  0x47   :  { %348 = vmatprep.subr.mxu0 %v63_v13  ;;  %393 = vmatprep.subr.mxu1 %v63_v13 }
  0x4a   :  { %349 = vmatpush3.xpose.msra.mxu0 %v63_v13  ;;  %409 = vmatpush3.xpose.msra.mxu1 %v63_v13 }
  0x4b   :  { %350 = vmatprep.subr.mxu0 %v62_v14  ;;  %394 = vmatprep.subr.mxu1 %v62_v14 }
  0x4e   :  { %351 = vmatpush3.xpose.msra.mxu0 %v62_v14  ;;  %410 = vmatpush3.xpose.msra.mxu1 %v62_v14 }
  0x4f   :  { %352 = vmatprep.subr.mxu0 %v61_v15  ;;  %395 = vmatprep.subr.mxu1 %v61_v15 }
  0x52   :  { %353 = vmatpush3.xpose.msra.mxu0 %v61_v15  ;;  %411 = vmatpush3.xpose.msra.mxu1 %v61_v15 }
  0x53   :  { %354 = vmatprep.subr.mxu0 %v60_v16  ;;  %396 = vmatprep.subr.mxu1 %v60_v16 }
  0x56   :  { %355 = vmatpush3.xpose.msra.mxu0 %v60_v16  ;;  %412 = vmatpush3.xpose.msra.mxu1 %v60_v16 }
  0x57   :  { %356 = vmatprep.subr.mxu0 %v59_v17  ;;  %397 = vmatprep.subr.mxu1 %v59_v17 }
  0x5a   :  { %357 = vmatpush3.xpose.msra.mxu0 %v59_v17  ;;  %413 = vmatpush3.xpose.msra.mxu1 %v59_v17 }
  0x5d   :  { %359 = vmatmul.mubr.f32.vlgmr.msra.gmra.mxu0 %v44_v18  ;;  %371 = vmatmul.mubr.f32.vlgmr.msra.gmra.mxu1 %v52_v19 }
  0x5e   :  { %361 = vmatprep.mubr.f32.mxu0 %v45_v20  ;;  %373 = vmatprep.mubr.f32.mxu1 %v53_v21 }
  0x61   :  { %362 = vmatmul.mubr.f32.gmra.mxu0 %v46_v22  ;;  %374 = vmatmul.mubr.f32.gmra.mxu1 %v54_v23 }
  0x62   :  { %364 = vmatprep.mubr.f32.mxu0 %v47_v24  ;;  %376 = vmatprep.mubr.f32.mxu1 %v55_v25 }
  0x65   :  { %365 = vmatmul.mubr.f32.gmra.mxu0 %v48_v26  ;;  %377 = vmatmul.mubr.f32.gmra.mxu1 %v56_v27 }
  0x66   :  { %367 = vmatprep.mubr.f32.mxu0 %v49_v28  ;;  %379 = vmatprep.mubr.f32.mxu1 %v57_v29 }
  0x69   :  { %368 = vmatmul.mubr.f32.gmra.mxu0 %v50_v30  ;;  %380 = vmatmul.mubr.f32.gmra.mxu1 %v58_v31 }
 0x11d   :  { %v360_v38 = vpop.f32.mrf.mxu0  ;;  %v372_v39 = vpop.f32.mrf.mxu1 }
 0x11e   :  { %v221_v40 = vmul.f32 0.088388346, %v360_v38  ;;  %v229_v41 = vmul.f32 0.088388346, %v372_v39 }
 0x11f   :  { %v141_v42 = vpop.f32.mrf.mxu0  ;;  %v181_v43 = vpop.f32.mrf.mxu1 }
 0x120   :  { %v245_v44 = vadd.f32 %v525_v37, %v221_v40  ;;  %v253_v45 = vadd.f32 %v525_v37, %v229_v41  ;;  %v220_v46 = vmul.f32 0.088388346, %v141_v42  ;;  %v228_v47 = vmul.f32 0.088388346, %v181_v43 }
 0x121   :  { %v363_v48 = vpop.f32.mrf.mxu0  ;;  %v375_v49 = vpop.f32.mrf.mxu1 }
 0x122   :  { %261 = vst [vmem:[#allocation7 + $0x8] sm:$0xff] %v245_v44  ;;  %269 = vst [vmem:[#allocation7 + $0x48] sm:$0xff] %v253_v45  ;;  %v244_v50 = vadd.f32 %v525_v37, %v220_v46  ;;  %v252_v51 = vadd.f32 %v525_v37, %v228_v47  ;;  %v223_v52 = vmul.f32 0.088388346, %v363_v48  ;;  %v231_v53 = vmul.f32 0.088388346, %v375_v49 }
 0x123   :  { %v151_v54 = vpop.f32.mrf.mxu0  ;;  %v191_v55 = vpop.f32.mrf.mxu1 }
 0x124   :  { %260 = vst [vmem:[#allocation7] sm:$0xff] %v244_v50  ;;  %268 = vst [vmem:[#allocation7 + $0x40] sm:$0xff] %v252_v51  ;;  %v247_v56 = vadd.f32 %v525_v37, %v223_v52  ;;  %v255_v57 = vadd.f32 %v525_v37, %v231_v53  ;;  %v222_v58 = vmul.f32 0.088388346, %v151_v54  ;;  %v230_v59 = vmul.f32 0.088388346, %v191_v55 }
 0x125   :  { %v366_v60 = vpop.f32.mrf.mxu0  ;;  %v378_v61 = vpop.f32.mrf.mxu1 }
 0x126   :  { %263 = vst [vmem:[#allocation7 + $0x18] sm:$0xff] %v247_v56  ;;  %271 = vst [vmem:[#allocation7 + $0x58] sm:$0xff] %v255_v57  ;;  %v246_v62 = vadd.f32 %v525_v37, %v222_v58  ;;  %v254_v63 = vadd.f32 %v525_v37, %v230_v59  ;;  %v225_v0 = vmul.f32 0.088388346, %v366_v60  ;;  %v233_v1 = vmul.f32 0.088388346, %v378_v61 }
 0x127   :  { %v161_v2 = vpop.f32.mrf.mxu0  ;;  %v201_v3 = vpop.f32.mrf.mxu1 }
 0x128   :  { %262 = vst [vmem:[#allocation7 + $0x10] sm:$0xff] %v246_v62  ;;  %270 = vst [vmem:[#allocation7 + $0x50] sm:$0xff] %v254_v63  ;;  %v249_v4 = vadd.f32 %v525_v37, %v225_v0  ;;  %v257_v5 = vadd.f32 %v525_v37, %v233_v1  ;;  %v224_v6 = vmul.f32 0.088388346, %v161_v2  ;;  %v232_v7 = vmul.f32 0.088388346, %v201_v3 }
 0x129   :  { %v369_v8 = vpop.f32.mrf.mxu0  ;;  %v381_v9 = vpop.f32.mrf.mxu1 }
 0x12a   :  { %265 = vst [vmem:[#allocation7 + $0x28] sm:$0xff] %v249_v4  ;;  %273 = vst [vmem:[#allocation7 + $0x68] sm:$0xff] %v257_v5  ;;  %v248_v10 = vadd.f32 %v525_v37, %v224_v6  ;;  %v256_v11 = vadd.f32 %v525_v37, %v232_v7  ;;  %v227_v12 = vmul.f32 0.088388346, %v369_v8  ;;  %v235_v13 = vmul.f32 0.088388346, %v381_v9 }
 0x12b   :  { %v171_v14 = vpop.f32.mrf.mxu0  ;;  %v211_v15 = vpop.f32.mrf.mxu1 }
 0x12c   :  { %264 = vst [vmem:[#allocation7 + $0x20] sm:$0xff] %v248_v10  ;;  %272 = vst [vmem:[#allocation7 + $0x60] sm:$0xff] %v256_v11  ;;  %v251_v16 = vadd.f32 %v525_v37, %v227_v12  ;;  %v259_v17 = vadd.f32 %v525_v37, %v235_v13  ;;  %v226_v18 = vmul.f32 0.088388346, %v171_v14  ;;  %v234_v19 = vmul.f32 0.088388346, %v211_v15 }
 0x12e   :  { %267 = vst [vmem:[#allocation7 + $0x38] sm:$0xff] %v251_v16  ;;  %275 = vst [vmem:[#allocation7 + $0x78] sm:$0xff] %v259_v17  ;;  %v250_v20 = vadd.f32 %v525_v37, %v226_v18  ;;  %v258_v21 = vadd.f32 %v525_v37, %v234_v19 }
 0x130   :  { %266 = vst [vmem:[#allocation7 + $0x30] sm:$0xff] %v250_v20  ;;  %274 = vst [vmem:[#allocation7 + $0x70] sm:$0xff] %v258_v21 }
 0x131   :  { %470 = shalt.err (!%p467_p0)
}
 0x132   :  { %287 = dma.vmem_to_hbm [thread:$0]  %s282_s24, 2048, %s552_s3, [#allocation4], %s486_s15, %s486_s15, %s487_s16  }
 0x133   :  { %483 = dma.done.wait [#allocation4], 2048  }
 0x134   :  { %484 = vsyncadd [#allocation4], 4294965248 }
 0x135   :  { %291 = vsyncpa [#allocation3], 1 }
 0x136   :  { %292 = vsyncpa [#allocation6], 1 }
 0x137   :  { %293 = vsyncpa [#allocation4], 1 }

// kernel: tpu_custom_call.1
= control target key start
LH: loop header
LB: loop body
LE: loop exit
PB: predicated region body
PF: predicated region fallthrough
CT: control target
= control target key end

     0   :  { %8 = vsyncpa [#allocation3], 0  ;;  %s549_s0 = inlined_call_operand.hbm [shape: f32[128,128], index: 0, kind: input, shape index: {}]   ;;  %s550_s1 = inlined_call_operand.hbm [shape: f32[128,128], index: 1, kind: input, shape index: {}]   ;;  %s551_s2 = inlined_call_operand.vmem [shape: f32[1,128], index: 2, kind: input, shape index: {}]   ;;  %s552_s3 = inlined_call_operand.hbm [shape: f32[128,128], index: 3, kind: output, shape index: {}]  }
   0x1   :  { %9 = vsyncpa [#allocation6], 0 }
   0x2   :  { %10 = vsyncpa [#allocation4], 0  ;;  %s485_s12 = smov [#allocation2]  }
   0x3   :  { %s16_s13 = sshll.u32 %s485_s12, 4  ;;  %s17_s13 = int_to_ptr.vmem [resolvable:$true] %s16_s13 }
   0x4   :  { %s427_s14 = scalar_lea.vmem %s17_s13, 2048  ;;  %p432_p1 = scmp.lt.s32.totalorder %s17_s13, %s17_s13 }
   0x5   :  { %p428_p0 = scmp.ne.s32.totalorder %s17_s13, %s427_s14  ;;  %p433_p2 = scmp.lt.s32.totalorder %s427_s14, %s427_s14 }
   0x7   :  { %p434_p3 = por %p433_p2, %p432_p1 }
   0x9   :  { %p435_p4 = pnand %p434_p3, %p428_p0 }
   0xb   :  { %438 = shalt.err (!%p435_p4)
}
   0xc   :  { %s486_s15 = smov 128   ;;  %s487_s16 = smov 8  }
   0xd   :  { %22 = dma.hbm_to_vmem [thread:$0]  %s549_s0, 2048, %s17_s13, [#allocation3], %s486_s15, %s486_s15, %s487_s16  }
   0xe   :  { %s488_s19 = smov [#allocation5]  }
   0xf   :  { %s28_s20 = sshll.u32 %s488_s19, 4  ;;  %s29_s20 = int_to_ptr.vmem [resolvable:$true] %s28_s20 }
  0x10   :  { %s447_s21 = scalar_lea.vmem %s29_s20, 2048  ;;  %p452_p6 = scmp.lt.s32.totalorder %s29_s20, %s29_s20 }
  0x11   :  { %p448_p5 = scmp.ne.s32.totalorder %s29_s20, %s447_s21  ;;  %p453_p7 = scmp.lt.s32.totalorder %s447_s21, %s447_s21 }
  0x13   :  { %p454_p8 = por %p453_p7, %p452_p6 }
  0x15   :  { %p455_p9 = pnand %p454_p8, %p448_p5 }
  0x17   :  { %458 = shalt.err (!%p455_p9)
}
  0x18   :  { %34 = dma.hbm_to_vmem [thread:$0]  %s550_s1, 2048, %s29_s20, [#allocation6], %s486_s15, %s486_s15, %s487_s16  }
  0x19   :  { %479 = dma.done.wait [#allocation3], 2048  }
  0x1a   :  { %480 = vsyncadd [#allocation3], 4294965248 }
  0x1b   :  { %481 = dma.done.wait [#allocation6], 2048  }
  0x1c   :  { %482 = vsyncadd [#allocation6], 4294965248  ;;  %v74_v0 = vld [vmem:[#allocation5 + $0x78] sm:$0xff]  ;;  %v73_v1 = vld [vmem:[#allocation5 + $0x70] sm:$0xff]  ;;  %v239_v32 = vlaneseq }
  0x1d   :  { %326 = vmatprep.subr.mxu0 %v74_v0  ;;  %382 = vmatprep.subr.mxu1 %v74_v0  ;;  %v72_v2 = vld [vmem:[#allocation5 + $0x68] sm:$0xff]  ;;  %v43_v3 = vld [vmem:[#allocation2] sm:$0xff]  ;;  %v70_v6 = vld [vmem:[#allocation5 + $0x58] sm:$0xff] }
  0x1e   :  { %327 = vmatpush3.xpose.msra.mxu0 %v74_v0  ;;  %398 = vmatpush3.xpose.msra.mxu1 %v74_v0  ;;  %v51_v4 = vld [vmem:[#allocation2 + $0x40] sm:$0xff]  ;;  %v69_v7 = vld [vmem:[#allocation5 + $0x50] sm:$0xff]  ;;  %v68_v8 = vld [vmem:[#allocation5 + $0x48] sm:$0xff]  ;;  %v240_v33 = vshrl.u32 %v239_v32, 7 }
  0x1f   :  { %328 = vmatprep.subr.mxu0 %v73_v1  ;;  %383 = vmatprep.subr.mxu1 %v73_v1  ;;  %v71_v5 = vld [vmem:[#allocation5 + $0x60] sm:$0xff]  ;;  %v66_v10 = vld [vmem:[#allocation5 + $0x38] sm:$0xff]  ;;  %v65_v11 = vld [vmem:[#allocation5 + $0x30] sm:$0xff] }
  0x20   :  { %358 = vmatprep.mubr.f32.mxu0 %v43_v3  ;;  %370 = vmatprep.mubr.f32.mxu1 %v51_v4  ;;  %v67_v9 = vld [vmem:[#allocation5 + $0x40] sm:$0xff]  ;;  %v64_v12 = vld [vmem:[#allocation5 + $0x28] sm:$0xff]  ;;  %v62_v14 = vld [vmem:[#allocation5 + $0x18] sm:$0xff]  ;;  %v241_v36 = vsub.s32 0, %v240_v33 }
  0x21   :  { %v63_v13 = vld [vmem:[#allocation5 + $0x20] sm:$0xff]  ;;  %v61_v15 = vld [vmem:[#allocation5 + $0x10] sm:$0xff]  ;;  %v60_v16 = vld [vmem:[#allocation5 + $0x8] sm:$0xff] }
  0x22   :  { %329 = vmatpush3.xpose.msra.mxu0 %v73_v1  ;;  %399 = vmatpush3.xpose.msra.mxu1 %v73_v1  ;;  %v59_v17 = vld [vmem:[#allocation5] sm:$0xff]  ;;  %v44_v18 = vld [vmem:[#allocation2 + $0x8] sm:$0xff]  ;;  %v45_v20 = vld [vmem:[#allocation2 + $0x10] sm:$0xff] }
  0x23   :  { %330 = vmatprep.subr.mxu0 %v72_v2  ;;  %384 = vmatprep.subr.mxu1 %v72_v2  ;;  %v52_v19 = vld [vmem:[#allocation2 + $0x48] sm:$0xff]  ;;  %v53_v21 = vld [vmem:[#allocation2 + $0x50] sm:$0xff]  ;;  %v46_v22 = vld [vmem:[#allocation2 + $0x18] sm:$0xff] }
  0x24   :  { %v54_v23 = vld [vmem:[#allocation2 + $0x58] sm:$0xff]  ;;  %v47_v24 = vld [vmem:[#allocation2 + $0x20] sm:$0xff]  ;;  %v48_v26 = vld [vmem:[#allocation2 + $0x28] sm:$0xff] }
  0x25   :  { %v55_v25 = vld [vmem:[#allocation2 + $0x60] sm:$0xff]  ;;  %v56_v27 = vld [vmem:[#allocation2 + $0x68] sm:$0xff]  ;;  %v49_v28 = vld [vmem:[#allocation2 + $0x30] sm:$0xff] }
  0x26   :  { %331 = vmatpush3.xpose.msra.mxu0 %v72_v2  ;;  %400 = vmatpush3.xpose.msra.mxu1 %v72_v2  ;;  %v57_v29 = vld [vmem:[#allocation2 + $0x70] sm:$0xff]  ;;  %v50_v30 = vld [vmem:[#allocation2 + $0x38] sm:$0xff]  ;;  %v236_v34 = vld [vmem:[%s551_s2] sm:$0x1]  ;;  %s489_s2 = smov [#allocation7]  }
  0x27   :  { %332 = vmatprep.subr.mxu0 %v71_v5  ;;  %385 = vmatprep.subr.mxu1 %v71_v5  ;;  %v58_v31 = vld [vmem:[#allocation2 + $0x78] sm:$0xff]  ;;  %v237_v35 = vmul.f32 0.5, %v236_v34  ;;  %s281_s24 = sshll.u32 %s489_s2, 4  ;;  %s282_s24 = int_to_ptr.vmem [resolvable:$true] %s281_s24 }
  0x28   :  { %s459_s25 = scalar_lea.vmem %s282_s24, 2048  ;;  %p464_p11 = scmp.lt.s32.totalorder %s282_s24, %s282_s24 }
  0x29   :  { %v525_v37 = vrot.slane %v237_v35, %v241_v36  ;;  %p460_p10 = scmp.ne.s32.totalorder %s282_s24, %s459_s25  ;;  %p465_p12 = scmp.lt.s32.totalorder %s459_s25, %s459_s25 }
  0x2a   :  { %333 = vmatpush3.xpose.msra.mxu0 %v71_v5  ;;  %401 = vmatpush3.xpose.msra.mxu1 %v71_v5 }
  0x2b   :  { %334 = vmatprep.subr.mxu0 %v70_v6  ;;  %386 = vmatprep.subr.mxu1 %v70_v6  ;;  %p466_p13 = por %p465_p12, %p464_p11 }
  0x2d   :  { %p467_p0 = pnand %p466_p13, %p460_p10 }
  0x2e   :  { %335 = vmatpush3.xpose.msra.mxu0 %v70_v6  ;;  %402 = vmatpush3.xpose.msra.mxu1 %v70_v6 }
  0x2f   :  { %336 = vmatprep.subr.mxu0 %v69_v7  ;;  %387 = vmatprep.subr.mxu1 %v69_v7 }
  0x32   :  { %337 = vmatpush3.xpose.msra.mxu0 %v69_v7  ;;  %403 = vmatpush3.xpose.msra.mxu1 %v69_v7 }
  0x33   :  { %338 = vmatprep.subr.mxu0 %v68_v8  ;;  %388 = vmatprep.subr.mxu1 %v68_v8 }
  0x36   :  { %339 = vmatpush3.xpose.msra.mxu0 %v68_v8  ;;  %404 = vmatpush3.xpose.msra.mxu1 %v68_v8 }
  0x37   :  { %340 = vmatprep.subr.mxu0 %v67_v9  ;;  %389 = vmatprep.subr.mxu1 %v67_v9 }
  0x3a   :  { %341 = vmatpush3.xpose.msra.mxu0 %v67_v9  ;;  %405 = vmatpush3.xpose.msra.mxu1 %v67_v9 }
  0x3b   :  { %342 = vmatprep.subr.mxu0 %v66_v10  ;;  %390 = vmatprep.subr.mxu1 %v66_v10 }
  0x3e   :  { %343 = vmatpush3.xpose.msra.mxu0 %v66_v10  ;;  %406 = vmatpush3.xpose.msra.mxu1 %v66_v10 }
  0x3f   :  { %344 = vmatprep.subr.mxu0 %v65_v11  ;;  %391 = vmatprep.subr.mxu1 %v65_v11 }
  0x42   :  { %345 = vmatpush3.xpose.msra.mxu0 %v65_v11  ;;  %407 = vmatpush3.xpose.msra.mxu1 %v65_v11 }
  0x43   :  { %346 = vmatprep.subr.mxu0 %v64_v12  ;;  %392 = vmatprep.subr.mxu1 %v64_v12 }
  0x46   :  { %347 = vmatpush3.xpose.msra.mxu0 %v64_v12  ;;  %408 = vmatpush3.xpose.msra.mxu1 %v64_v12 }
  0x47   :  { %348 = vmatprep.subr.mxu0 %v63_v13  ;;  %393 = vmatprep.subr.mxu1 %v63_v13 }
  0x4a   :  { %349 = vmatpush3.xpose.msra.mxu0 %v63_v13  ;;  %409 = vmatpush3.xpose.msra.mxu1 %v63_v13 }
  0x4b   :  { %350 = vmatprep.subr.mxu0 %v62_v14  ;;  %394 = vmatprep.subr.mxu1 %v62_v14 }
  0x4e   :  { %351 = vmatpush3.xpose.msra.mxu0 %v62_v14  ;;  %410 = vmatpush3.xpose.msra.mxu1 %v62_v14 }
  0x4f   :  { %352 = vmatprep.subr.mxu0 %v61_v15  ;;  %395 = vmatprep.subr.mxu1 %v61_v15 }
  0x52   :  { %353 = vmatpush3.xpose.msra.mxu0 %v61_v15  ;;  %411 = vmatpush3.xpose.msra.mxu1 %v61_v15 }
  0x53   :  { %354 = vmatprep.subr.mxu0 %v60_v16  ;;  %396 = vmatprep.subr.mxu1 %v60_v16 }
  0x56   :  { %355 = vmatpush3.xpose.msra.mxu0 %v60_v16  ;;  %412 = vmatpush3.xpose.msra.mxu1 %v60_v16 }
  0x57   :  { %356 = vmatprep.subr.mxu0 %v59_v17  ;;  %397 = vmatprep.subr.mxu1 %v59_v17 }
  0x5a   :  { %357 = vmatpush3.xpose.msra.mxu0 %v59_v17  ;;  %413 = vmatpush3.xpose.msra.mxu1 %v59_v17 }
  0x5d   :  { %359 = vmatmul.mubr.f32.vlgmr.msra.gmra.mxu0 %v44_v18  ;;  %371 = vmatmul.mubr.f32.vlgmr.msra.gmra.mxu1 %v52_v19 }
  0x5e   :  { %361 = vmatprep.mubr.f32.mxu0 %v45_v20  ;;  %373 = vmatprep.mubr.f32.mxu1 %v53_v21 }
  0x61   :  { %362 = vmatmul.mubr.f32.gmra.mxu0 %v46_v22  ;;  %374 = vmatmul.mubr.f32.gmra.mxu1 %v54_v23 }
  0x62   :  { %364 = vmatprep.mubr.f32.mxu0 %v47_v24  ;;  %376 = vmatprep.mubr.f32.mxu1 %v55_v25 }
  0x65   :  { %365 = vmatmul.mubr.f32.gmra.mxu0 %v48_v26  ;;  %377 = vmatmul.mubr.f32.gmra.mxu1 %v56_v27 }
  0x66   :  { %367 = vmatprep.mubr.f32.mxu0 %v49_v28  ;;  %379 = vmatprep.mubr.f32.mxu1 %v57_v29 }
  0x69   :  { %368 = vmatmul.mubr.f32.gmra.mxu0 %v50_v30  ;;  %380 = vmatmul.mubr.f32.gmra.mxu1 %v58_v31 }
 0x11d   :  { %v360_v38 = vpop.f32.mrf.mxu0  ;;  %v372_v39 = vpop.f32.mrf.mxu1 }
 0x11e   :  { %v221_v40 = vmul.f32 0.088388346, %v360_v38  ;;  %v229_v41 = vmul.f32 0.088388346, %v372_v39 }
 0x11f   :  { %v141_v42 = vpop.f32.mrf.mxu0  ;;  %v181_v43 = vpop.f32.mrf.mxu1 }
 0x120   :  { %v245_v44 = vadd.f32 %v525_v37, %v221_v40  ;;  %v253_v45 = vadd.f32 %v525_v37, %v229_v41  ;;  %v220_v46 = vmul.f32 0.088388346, %v141_v42  ;;  %v228_v47 = vmul.f32 0.088388346, %v181_v43 }
 0x121   :  { %v363_v48 = vpop.f32.mrf.mxu0  ;;  %v375_v49 = vpop.f32.mrf.mxu1 }
 0x122   :  { %261 = vst [vmem:[#allocation7 + $0x8] sm:$0xff] %v245_v44  ;;  %269 = vst [vmem:[#allocation7 + $0x48] sm:$0xff] %v253_v45  ;;  %v244_v50 = vadd.f32 %v525_v37, %v220_v46  ;;  %v252_v51 = vadd.f32 %v525_v37, %v228_v47  ;;  %v223_v52 = vmul.f32 0.088388346, %v363_v48  ;;  %v231_v53 = vmul.f32 0.088388346, %v375_v49 }
 0x123   :  { %v151_v54 = vpop.f32.mrf.mxu0  ;;  %v191_v55 = vpop.f32.mrf.mxu1 }
 0x124   :  { %260 = vst [vmem:[#allocation7] sm:$0xff] %v244_v50  ;;  %268 = vst [vmem:[#allocation7 + $0x40] sm:$0xff] %v252_v51  ;;  %v247_v56 = vadd.f32 %v525_v37, %v223_v52  ;;  %v255_v57 = vadd.f32 %v525_v37, %v231_v53  ;;  %v222_v58 = vmul.f32 0.088388346, %v151_v54  ;;  %v230_v59 = vmul.f32 0.088388346, %v191_v55 }
 0x125   :  { %v366_v60 = vpop.f32.mrf.mxu0  ;;  %v378_v61 = vpop.f32.mrf.mxu1 }
 0x126   :  { %263 = vst [vmem:[#allocation7 + $0x18] sm:$0xff] %v247_v56  ;;  %271 = vst [vmem:[#allocation7 + $0x58] sm:$0xff] %v255_v57  ;;  %v246_v62 = vadd.f32 %v525_v37, %v222_v58  ;;  %v254_v63 = vadd.f32 %v525_v37, %v230_v59  ;;  %v225_v0 = vmul.f32 0.088388346, %v366_v60  ;;  %v233_v1 = vmul.f32 0.088388346, %v378_v61 }
 0x127   :  { %v161_v2 = vpop.f32.mrf.mxu0  ;;  %v201_v3 = vpop.f32.mrf.mxu1 }
 0x128   :  { %262 = vst [vmem:[#allocation7 + $0x10] sm:$0xff] %v246_v62  ;;  %270 = vst [vmem:[#allocation7 + $0x50] sm:$0xff] %v254_v63  ;;  %v249_v4 = vadd.f32 %v525_v37, %v225_v0  ;;  %v257_v5 = vadd.f32 %v525_v37, %v233_v1  ;;  %v224_v6 = vmul.f32 0.088388346, %v161_v2  ;;  %v232_v7 = vmul.f32 0.088388346, %v201_v3 }
 0x129   :  { %v369_v8 = vpop.f32.mrf.mxu0  ;;  %v381_v9 = vpop.f32.mrf.mxu1 }
 0x12a   :  { %265 = vst [vmem:[#allocation7 + $0x28] sm:$0xff] %v249_v4  ;;  %273 = vst [vmem:[#allocation7 + $0x68] sm:$0xff] %v257_v5  ;;  %v248_v10 = vadd.f32 %v525_v37, %v224_v6  ;;  %v256_v11 = vadd.f32 %v525_v37, %v232_v7  ;;  %v227_v12 = vmul.f32 0.088388346, %v369_v8  ;;  %v235_v13 = vmul.f32 0.088388346, %v381_v9 }
 0x12b   :  { %v171_v14 = vpop.f32.mrf.mxu0  ;;  %v211_v15 = vpop.f32.mrf.mxu1 }
 0x12c   :  { %264 = vst [vmem:[#allocation7 + $0x20] sm:$0xff] %v248_v10  ;;  %272 = vst [vmem:[#allocation7 + $0x60] sm:$0xff] %v256_v11  ;;  %v251_v16 = vadd.f32 %v525_v37, %v227_v12  ;;  %v259_v17 = vadd.f32 %v525_v37, %v235_v13  ;;  %v226_v18 = vmul.f32 0.088388346, %v171_v14  ;;  %v234_v19 = vmul.f32 0.088388346, %v211_v15 }
 0x12e   :  { %267 = vst [vmem:[#allocation7 + $0x38] sm:$0xff] %v251_v16  ;;  %275 = vst [vmem:[#allocation7 + $0x78] sm:$0xff] %v259_v17  ;;  %v250_v20 = vadd.f32 %v525_v37, %v226_v18  ;;  %v258_v21 = vadd.f32 %v525_v37, %v234_v19 }
 0x130   :  { %266 = vst [vmem:[#allocation7 + $0x30] sm:$0xff] %v250_v20  ;;  %274 = vst [vmem:[#allocation7 + $0x70] sm:$0xff] %v258_v21 }
 0x131   :  { %470 = shalt.err (!%p467_p0)
}
 0x132   :  { %287 = dma.vmem_to_hbm [thread:$0]  %s282_s24, 2048, %s552_s3, [#allocation4], %s486_s15, %s486_s15, %s487_s16  }
 0x133   :  { %483 = dma.done.wait [#allocation4], 2048  }
 0x134   :  { %484 = vsyncadd [#allocation4], 4294965248 }
 0x135   :  { %291 = vsyncpa [#allocation3], 1 }
 0x136   :  { %292 = vsyncpa [#allocation6], 1 }
 0x137   :  { %293 = vsyncpa [#allocation4], 1 }

</bundles_post_ra>
